<compile_context>
chip_gen: v5e
topology: v5e:2x2
jax: 0.10.0
libtpu: 0.0.40
codegen_flags: <defaults>
</compile_context>

<pallas_src>
import functools

import jax
import jax.numpy as jnp
from jax.experimental import pallas as pl
from jax.experimental.pallas import tpu as pltpu


def _round_up(x: int, m: int) -> int:
    return ((x + m - 1) // m) * m


def _ce_tile_kernel(logits_ref, y_ref, psum_ref, *, n_valid: int):
    """Per-tile partial sum of per-row NLL; rows >= n_valid contribute 0."""
    i = pl.program_id(0)

    # Cast once to f32 before any arithmetic (avoids bf16 rounding of the
    # max-shift; free in an HBM-bandwidth-bound kernel).
    logits = logits_ref[...].astype(jnp.float32)                 # (tn, C) f32
    y = y_ref[...]                                               # (tn, 1) int32
    tn, c = logits.shape

    # Numerically stable log-sum-exp.  `shifted` has a single consumer
    # (exp -> sum -> log); the target gather reads the f32 logits directly.
    row_max = jnp.max(logits, axis=-1, keepdims=True)            # (tn, 1)
    shifted = logits - row_max                                   # (tn, C)
    lse = jnp.log(jnp.sum(jnp.exp(shifted), axis=-1, keepdims=True)) + row_max

    # Fused one-hot gather of the target-class logit (VPU compare + select).
    class_ids = jax.lax.broadcasted_iota(jnp.int32, (tn, c), 1)  # (tn, C)
    tgt = jnp.sum(jnp.where(class_ids == y, logits, 0.0),
                  axis=-1, keepdims=True)                        # (tn, 1)

    nll = lse - tgt                                              # (tn, 1)

    # Select-mask rows past the true batch size: the clamped boundary block
    # may contain arbitrary (even NaN) data, so a select is the only safe mask.
    row_ids = i * tn + jax.lax.broadcasted_iota(jnp.int32, (tn, 1), 0)
    nll = jnp.where(row_ids < n_valid, nll, 0.0)

    # One tiny store per grid step instead of tn/8 masked per-row stores.
    psum_ref[...] = jnp.sum(nll, axis=0, keepdims=True)[None]    # (1, 1, 1)


def _vmem_budgets() -> tuple[int, int]:
    """Returns (scoped vmem_limit_bytes, working-set byte budget) per TPU gen."""
    try:
        cap = int(pltpu.get_tpu_info().vmem_capacity_bytes)
    except Exception:
        cap = 64 * 1024 * 1024                 # conservative: v7x per-TC VMEM
    if cap >= 96 * 1024 * 1024:                # v5e / v6e: 128 MiB physical
        return 64 * 1024 * 1024, 48 * 1024 * 1024
    return 44 * 1024 * 1024, 28 * 1024 * 1024  # v7x: 64 MiB per TC


def categorical_loss(yh: jax.Array, y: jax.Array) -> jax.Array:
    """Cross-entropy loss (mean reduction) of logits yh (N, C) vs targets y (N,)."""
    n, c = yh.shape
    itemsize = jnp.dtype(yh.dtype).itemsize
    vmem_limit, work_budget = _vmem_budgets()

    # Sublane alignment: 8 rows for 32-bit dtypes, 16 for 16-bit, 32 for 8-bit.
    row_align = max(8, 32 // max(1, itemsize))

    # Per-row VMEM footprint (bytes):
    #   2 * C * itemsize : double-buffered logits block
    #   2 * 128 * 4      : double-buffered (tn,1) int32 targets block, lane-padded
    #   ~3 * C * 4       : in-kernel f32 logits / exp chain / i32 iota intermediates
    per_row = 2 * c * itemsize + 2 * 128 * 4 + 3 * c * 4
    budget_rows = max(row_align, (work_budget // per_row) // row_align * row_align)

    # Keep >= ~4 grid steps when the batch allows it: shards the "parallel"
    # axis across both TensorCores on v7x and leaves room for pipeline overlap.
    cap_rows = max(row_align, _round_up(pl.cdiv(n, 4), row_align))
    tile_n = min(budget_rows, cap_rows)

    num_tiles = pl.cdiv(n, tile_n)

    # No padding of the logits: the boundary block is clamped by Pallas and
    # masked in-kernel.  Targets are just reshaped to (N, 1) int32.
    y2 = y.astype(jnp.int32).reshape(n, 1)

    kernel = functools.partial(_ce_tile_kernel, n_valid=n)

    cost = pl.CostEstimate(
        flops=5 * n * c,
        transcendentals=n * (c + 1),              # exp per element + log per row
        bytes_accessed=n * c * itemsize + n * 4 + num_tiles * 4,
    )

    partial_sums = pl.pallas_call(
        kernel,
        out_shape=jax.ShapeDtypeStruct((num_tiles, 1, 1), jnp.float32),
        grid_spec=pl.GridSpec(
            grid=(num_tiles,),
            in_specs=[
                pl.BlockSpec((tile_n, c), lambda i: (i, 0)),      # logits tile
                pl.BlockSpec((tile_n, 1), lambda i: (i, 0)),      # targets tile
            ],
            out_specs=pl.BlockSpec((1, 1, 1), lambda i: (i, 0, 0)),  # tile partial
        ),
        compiler_params=pltpu.CompilerParams(
            dimension_semantics=("parallel",),    # independent tiles -> megacore
            vmem_limit_bytes=vmem_limit,
        ),
        cost_estimate=cost,
    )(yh, y2)

    # Single tiny scalar collapse outside the grid loop (num_tiles values).
    return jnp.sum(partial_sums) / jnp.float32(n)


if __name__ == "__main__":
    key = jax.random.PRNGKey(0)
    k_logits, k_targets = jax.random.split(key)

    N, C = 8, 32  # small shapes: batch=8, num_classes=32
    yh = jax.random.normal(k_logits, (N, C), dtype=jnp.float32)
    y = jax.random.randint(k_targets, (N,), 0, C, dtype=jnp.int32)

    loss = jax.block_until_ready(categorical_loss(yh, y))

    # Reference check in plain JAX (same math as torch.nn.CrossEntropyLoss).
    lse = jax.scipy.special.logsumexp(yh, axis=-1)
    ref = jnp.mean(lse - yh[jnp.arange(N), y])
    assert jnp.allclose(loss, ref, rtol=1e-5, atol=1e-5), (loss, ref)

    print("KERNEL_OK")
</pallas_src>

<mosaic_0001>
module attributes {stable_mosaic.version = 11 : i64} {
  func.func @_ce_tile_kernel(%arg0: i32, %arg1: memref<8x32xf32, #tpu.memory_space<vmem>>, %arg2: memref<8x1xi32, #tpu.memory_space<vmem>>, %arg3: memref<1x1x1xf32, #tpu.memory_space<vmem>>) attributes {dimension_semantics = [#tpu.dimension_semantics<parallel>], iteration_bounds = array<i64: 1>, scalar_prefetch = 0 : i64, scratch_operands = 0 : i64, tpu.core_type = #tpu.core_type<tc>, window_params = [{transform_indices = @transform_0, window_bounds = array<i64: 8, 32>}, {transform_indices = @transform_1, window_bounds = array<i64: 8, 1>}, {transform_indices = @transform_2, window_bounds = array<i64: 1, 1, 1>}]} {
    %c0 = arith.constant 0 : index
    %c0_0 = arith.constant 0 : index
    %0 = vector.load %arg1[%c0, %c0_0] : memref<8x32xf32, #tpu.memory_space<vmem>>, vector<8x32xf32>
    %c0_1 = arith.constant 0 : index
    %c0_2 = arith.constant 0 : index
    %1 = vector.load %arg2[%c0_1, %c0_2] : memref<8x1xi32, #tpu.memory_space<vmem>>, vector<8x1xi32>
    %cst = arith.constant dense<0xFF800000> : vector<8xf32>
    %2 = vector.multi_reduction <maximumf>, %0, %cst [1] : vector<8x32xf32> to vector<8xf32>
    %3 = vector.shape_cast %2 : vector<8xf32> to vector<8x1xf32>
    %4 = vector.broadcast %3 : vector<8x1xf32> to vector<8x32xf32>
    %5 = arith.subf %0, %4 : vector<8x32xf32>
    %6 = math.exp %5 : vector<8x32xf32>
    %cst_3 = arith.constant dense<0.000000e+00> : vector<8xf32>
    %7 = vector.multi_reduction <add>, %6, %cst_3 [1] : vector<8x32xf32> to vector<8xf32>
    %8 = vector.shape_cast %7 : vector<8xf32> to vector<8x1xf32>
    %9 = math.log %8 : vector<8x1xf32>
    %10 = arith.addf %9, %3 : vector<8x1xf32>
    %11 = tpu.iota {dimensions = array<i32: 1>} : vector<8x32xi32>
    %12 = vector.broadcast %1 : vector<8x1xi32> to vector<8x32xi32>
    %13 = arith.cmpi eq, %11, %12 : vector<8x32xi32>
    %cst_4 = arith.constant 0.000000e+00 : f32
    %14 = vector.broadcast %cst_4 : f32 to vector<8x32xf32>
    %15 = arith.select %13, %0, %14 : vector<8x32xi1>, vector<8x32xf32>
    %cst_5 = arith.constant dense<0.000000e+00> : vector<8xf32>
    %16 = vector.multi_reduction <add>, %15, %cst_5 [1] : vector<8x32xf32> to vector<8xf32>
    %17 = vector.shape_cast %16 : vector<8xf32> to vector<8x1xf32>
    %18 = arith.subf %10, %17 : vector<8x1xf32>
    %c8_i32 = arith.constant 8 : i32
    %19 = arith.muli %arg0, %c8_i32 : i32
    %20 = tpu.iota {dimensions = array<i32: 0>} : vector<8x1xi32>
    %21 = vector.broadcast %19 : i32 to vector<8x1xi32>
    %22 = arith.addi %21, %20 : vector<8x1xi32>
    %c8_i32_6 = arith.constant 8 : i32
    %23 = vector.broadcast %c8_i32_6 : i32 to vector<8x1xi32>
    %24 = arith.cmpi slt, %22, %23 : vector<8x1xi32>
    %cst_7 = arith.constant 0.000000e+00 : f32
    %25 = vector.broadcast %cst_7 : f32 to vector<8x1xf32>
    %26 = arith.select %24, %18, %25 : vector<8x1xi1>, vector<8x1xf32>
    %cst_8 = arith.constant dense<0.000000e+00> : vector<1xf32>
    %27 = vector.multi_reduction <add>, %26, %cst_8 [0] : vector<8x1xf32> to vector<1xf32>
    %28 = vector.shape_cast %27 : vector<1xf32> to vector<1x1xf32>
    %29 = vector.shape_cast %28 : vector<1x1xf32> to vector<1x1x1xf32>
    %c0_9 = arith.constant 0 : index
    %c0_10 = arith.constant 0 : index
    %c0_11 = arith.constant 0 : index
    %30 = vector.load %arg3[%c0_9, %c0_10, %c0_11] : memref<1x1x1xf32, #tpu.memory_space<vmem>>, vector<1x1x1xf32>
    tpu.vector_store %arg3[%c0_9, %c0_10, %c0_11], %29 {strides = array<i32>} : memref<1x1x1xf32, #tpu.memory_space<vmem>>, vector<1x1x1xf32>,
    return
  }
  func.func @transform_0(%arg0: i32) -> (i32, i32) {
    %c0_i32 = arith.constant 0 : i32
    %c0_i32_0 = arith.constant 0 : i32
    return %arg0, %c0_i32 : i32, i32
  }
  func.func @transform_1(%arg0: i32) -> (i32, i32) {
    %c0_i32 = arith.constant 0 : i32
    %c0_i32_0 = arith.constant 0 : i32
    return %arg0, %c0_i32 : i32, i32
  }
  func.func @transform_2(%arg0: i32) -> (i32, i32, i32) {
    %c0_i32 = arith.constant 0 : i32
    %c0_i32_0 = arith.constant 0 : i32
    %c0_i32_1 = arith.constant 0 : i32
    return %arg0, %c0_i32, %c0_i32_0 : i32, i32, i32
  }
}

</mosaic_0001>

<bundles_post_ra>
// kernel: tpu_custom_call.1
= control target key start
LH: loop header
LB: loop body
LE: loop exit
PB: predicated region body
PF: predicated region fallthrough
CT: control target
= control target key end

     0   :  { %vm14_vm0 = vcmask 261120   ;;  %s131_s0 = inlined_call_operand.vmem [shape: f32[8,32], index: 0, kind: input, shape index: {}]   ;;  %s132_s1 = inlined_call_operand.vmem [shape: s32[8,1], index: 1, kind: input, shape index: {}]   ;;  %s133_s2 = inlined_call_operand.hbm [shape: f32[1,1,1], index: 2, kind: output, shape index: {}]  }
   0x1   :  { %v12_v0 = vld [vmem:[%s131_s0] sm:$0xff] }
   0x2   :  { %7 = vsyncpa [#allocation3], 0  ;;  %v15_v1 = vsel %vm14_vm0, %v12_v0, -inf  ;;  %v102_v2 = vmov 0   ;;  %v13_v3 = vld [vmem:[%s132_s1] sm:$0xff]  ;;  %v27_v9 = vlaneseq  ;;  %s103_s0 = smov [#allocation2]  }
   0x3   :  { %71 = vset.pattern.permute.xlu0 %v102_v2  ;;  %s58_s1 = sshll.u32 %s103_s0, 4  ;;  %s60_s15 = sshll.u32 %s133_s2, 4  ;;  %vm51_vm2 = vcmask 0   ;;  %s59_s1 = int_to_ptr.vmem [resolvable:$true] %s58_s1  ;;  %s61_s15 = int_to_ptr.hbm [resolvable:$true] %s60_s15 }
   0x4   :  { %16 = vmax.xlane.f32.xlu0 %v15_v1  ;;  %v28_v10 = vand.u32 127, %v27_v9 }
  0x18   :  { %30 = vperm.xlu0 %71, %v13_v3  }
  0x77   :  { %v17_v4 = vpop.xlane.xlu0 %16 }
  0x78   :  { %v18_v5 = vsub.f32 %v12_v0, %v17_v4 }
  0x7a   :  { %v19_v6 = vmul.f32 1.442695, %v18_v5 }
  0x7c   :  { %72 = vpow2.f32 %v19_v6 }
  0x82   :  { %v73_v7 = vpop.eup %72 }
  0x83   :  { %v21_v8 = vsel %vm14_vm0, %v73_v7, 0.0 }
  0x84   :  { %22 = vadd.xlane.f32.xlu1 %v21_v8 }
  0x8a   :  { %v31_v11 = vpop.permute.xlu0 %30 }
  0x8b   :  { %vm32_vm1 = vcmp.eq.s32.totalorder %v28_v10, %v31_v11 }
  0x8c   :  { %v33_v12 = vsel %vm32_vm1, %v12_v0, 0.0 }
  0x8d   :  { %v34_v13 = vsel %vm14_vm0, %v33_v12, 0.0 }
  0x8e   :  { %35 = vadd.xlane.f32.xlu1 %v34_v13 }
  0xf7   :  { %v23_v14 = vpop.xlane.xlu1 %22 }
  0xf8   :  { %74 = vlog2.f32 %v23_v14 }
  0xfe   :  { %v75_v15 = vpop.eup %74 }
  0xff   :  { %v25_v16 = vmul.f32 0.6931472, %v75_v15 }
 0x101   :  { %v26_v17 = vadd.f32 %v25_v16, %v17_v4  ;;  %v36_v18 = vpop.xlane.xlu1 %35 }
 0x103   :  { %v37_v19 = vsub.f32 %v26_v17, %v36_v18 }
 0x105   :  { %v45_v20 = vrot.slane %v37_v19, 4 }
 0x107   :  { %v46_v21 = vadd.f32 %v45_v20, %v37_v19 }
 0x109   :  { %v47_v22 = vrot.slane %v46_v21, 2 }
 0x10b   :  { %v48_v23 = vadd.f32 %v47_v22, %v46_v21 }
 0x10d   :  { %v49_v24 = vrot.slane %v48_v23, 1 }
 0x10f   :  { %v50_v25 = vadd.f32 %v49_v24, %v48_v23 }
 0x111   :  { %52 = vst.msk [vmem:[#allocation2] sm:$0x1] %vm51_vm2, %v50_v25 }
 0x112   :  { %63 = dma.vmem_to_hbm [thread:$0]  %s59_s1, 16, %s61_s15, [#allocation3]  }
 0x113   :  { %100 = dma.done.wait [#allocation3], 16  }
 0x114   :  { %101 = vsyncadd [#allocation3], 4294967280 }
 0x115   :  { %68 = vsyncpa [#allocation3], 1 }

</bundles_post_ra>
